<compile_context>
chip_gen: v5e
topology: v5e:2x2
jax: 0.10.0
libtpu: 0.0.40
codegen_flags: <defaults>
</compile_context>

<pallas_src>
import jax
import jax.numpy as jnp
from jax.experimental import pallas as pl
from jax.experimental.pallas import tpu as pltpu


def _round_up(x, m):
    return (x + m - 1) // m * m


def _choose_bm(batch, target=256):
    """Batch tile: multiple of 8, <= target, >= 2 grid steps when possible."""
    b8 = _round_up(batch, 8)
    if b8 <= 16:
        return b8
    return min(target, _round_up(b8 // 2, 8))


def _vmem_limit_bytes(bm, input_dim, hidden_dim, f_pad):
    bf16, f32 = 2, 4
    est = (2 * bm * input_dim * bf16                                      # x tile (2 bufs)
           + 2 * (input_dim * hidden_dim + hidden_dim * f_pad) * bf16    # weights (2 bufs)
           + 2 * (hidden_dim + f_pad) * f32                              # biases
           + 2 * 2 * bm * f_pad * f32)                                   # 2 f32 outputs (2 bufs)
    # 2x headroom for compiler temporaries, clamped to [32 MiB, 64 MiB (v7x physical)]
    return int(min(max(2 * est, 32 * 1024 * 1024), 64 * 1024 * 1024))


# ----------------------------------------------------------------------------
# Pallas kernel: fused MLP (Linear -> ReLU -> Linear) + softmax epilogue
# ----------------------------------------------------------------------------
def _cond_categorical_kernel(x_ref, w1_ref, b1_ref, w2_ref, b2_ref,
                             logits_ref, probs_ref):
    # Hidden dense layer: bf16 operands, f32 accumulation on the MXU; ReLU on VPU.
    h = jnp.dot(x_ref[...], w1_ref[...], preferred_element_type=jnp.float32)
    h = jnp.maximum(h + b1_ref[...], 0.0)

    # Final dense layer -> raw logits.  Padded class lanes carry b2 = -1e30.
    logits = jnp.dot(h.astype(jnp.bfloat16), w2_ref[...],
                     preferred_element_type=jnp.float32)
    logits = logits + b2_ref[...]
    logits_ref[...] = logits.astype(logits_ref.dtype)

    # probs = softmax(logits) over the class (lane) axis; padded lanes -> 0.
    m = jnp.max(logits, axis=-1, keepdims=True)              # XLU reduce
    e = jnp.exp(logits - m)                                   # EUP
    s = jnp.sum(e, axis=-1, keepdims=True)                    # XLU reduce
    probs_ref[...] = (e * pl.reciprocal(s, approx=True)).astype(probs_ref.dtype)


def conditional_categorical_forward(tensor_list, params, *, temperature=1.0,
                                    bm=None):
    """Returns (logits, probs, temperature) of RelaxedOneHotCategorical."""
    # Glue in plain JAX: concatenation of the conditioning tensors.
    x = jnp.concatenate(tensor_list, axis=-1).astype(jnp.float32)
    w1, b1, w2, b2 = params
    batch, input_dim = x.shape
    hidden_dim = w1.shape[1]
    final_dim = w2.shape[1]

    # --- lane-dense output layout: pad class dim to a multiple of 128 --------
    f_pad = _round_up(final_dim, 128)
    w2_p = jnp.zeros((hidden_dim, f_pad), jnp.float32).at[:, :final_dim].set(w2)
    b2_p = jnp.full((1, f_pad), -1e30, jnp.float32).at[:, :final_dim].set(b2)

    # --- batch tiling ---------------------------------------------------------
    if bm is None:
        bm = _choose_bm(batch)
    b_pad = _round_up(batch, bm)
    if b_pad != batch:
        x = jnp.pad(x, ((0, b_pad - batch), (0, 0)))

    # bf16 operands (f32 accumulation happens inside the kernel).
    x_bf = x.astype(jnp.bfloat16)
    w1_bf = w1.astype(jnp.bfloat16)
    w2_bf = w2_p.astype(jnp.bfloat16)

    grid = (b_pad // bm,)
    # NOTE: weights/biases have constant index_maps so they are fetched once and
    # stay resident; single-buffering them (pl.Buffered(1)) would halve their
    # VMEM footprint but is left at the default for portability.
    logits, probs = pl.pallas_call(
        _cond_categorical_kernel,
        out_shape=(
            jax.ShapeDtypeStruct((b_pad, f_pad), jnp.float32),
            jax.ShapeDtypeStruct((b_pad, f_pad), jnp.float32),
        ),
        grid_spec=pltpu.PrefetchScalarGridSpec(
            num_scalar_prefetch=0,
            grid=grid,
            in_specs=[
                pl.BlockSpec((bm, input_dim), lambda i: (i, 0)),          # x tile
                pl.BlockSpec((input_dim, hidden_dim), lambda i: (0, 0)),  # W1 (resident)
                pl.BlockSpec((1, hidden_dim), lambda i: (0, 0)),          # b1
                pl.BlockSpec((hidden_dim, f_pad), lambda i: (0, 0)),      # W2 (resident, padded)
                pl.BlockSpec((1, f_pad), lambda i: (0, 0)),               # b2 (pad = -1e30 mask)
            ],
            out_specs=[
                pl.BlockSpec((bm, f_pad), lambda i: (i, 0)),              # logits (lane-dense)
                pl.BlockSpec((bm, f_pad), lambda i: (i, 0)),              # probs  (lane-dense)
            ],
        ),
        compiler_params=pltpu.CompilerParams(
            dimension_semantics=("parallel",),
            vmem_limit_bytes=_vmem_limit_bytes(bm, input_dim, hidden_dim, f_pad),
        ),
    )(x_bf, w1_bf, b1, w2_bf, b2_p)

    logits = logits[:batch, :final_dim]
    probs = probs[:batch, :final_dim]
    # TODO(synk): RelaxedOneHotCategorical object API (rsample via
    # Gumbel-softmax with `temperature`, log_prob) is a distribution wrapper,
    # not a tensor op of forward(); only its parameters are produced here
    # (normalized logits == log(probs)).
    return logits, probs, temperature


# ----------------------------------------------------------------------------
# Deterministic parameter init (shapes implied by the module's __init__):
#   dense_hidden_dims=[hidden_dim]  ->  Linear(input_dim, hidden) -> ReLU ->
#                                       Linear(hidden, final_dim)
#   (the trailing activation is dropped by `w_dense_layers[:-1]`; dropout=0)
# ----------------------------------------------------------------------------
def init_params(key, input_dim, hidden_dim, final_dim):
    k1, k2, k3, k4 = jax.random.split(key, 4)
    s1 = 1.0 / jnp.sqrt(jnp.float32(input_dim))
    s2 = 1.0 / jnp.sqrt(jnp.float32(hidden_dim))
    w1 = jax.random.uniform(k1, (input_dim, hidden_dim), jnp.float32, -s1, s1)
    b1 = jax.random.uniform(k2, (1, hidden_dim), jnp.float32, -s1, s1)
    w2 = jax.random.uniform(k3, (hidden_dim, final_dim), jnp.float32, -s2, s2)
    b2 = jax.random.uniform(k4, (1, final_dim), jnp.float32, -s2, s2)
    return w1, b1, w2, b2


def _reference_forward(tensor_list, params):
    x = jnp.concatenate(tensor_list, axis=-1)
    w1, b1, w2, b2 = params
    h = jnp.maximum(x @ w1 + b1, 0.0)
    logits = h @ w2 + b2
    return logits, jax.nn.softmax(logits, axis=-1)


if __name__ == "__main__":
    # Small shapes consistent with the forward pass: two conditioning tensors
    # (B, 24) and (B, 8) -> input_dim = 32; dense_hidden_dims = [32];
    # final_dim = 10 classes; temperature = 0.5.
    # (B=20 exercises batch padding and a 2-step parallel grid.)
    B, d1, d2 = 20, 24, 8
    input_dim = d1 + d2
    hidden_dim = 32
    final_dim = 10
    temperature = 0.5

    key = jax.random.PRNGKey(0)
    kx1, kx2, kp = jax.random.split(key, 3)
    t1 = jax.random.normal(kx1, (B, d1), jnp.float32)
    t2 = jax.random.normal(kx2, (B, d2), jnp.float32)
    params = init_params(kp, input_dim, hidden_dim, final_dim)

    logits, probs, temp = conditional_categorical_forward(
        [t1, t2], params, temperature=temperature)
    jax.block_until_ready((logits, probs))

    # Sanity check against a pure-JAX f32 reference (bf16 matmul operands in
    # the kernel -> loosened tolerance).
    ref_logits, ref_probs = _reference_forward([t1, t2], params)
    assert logits.shape == (B, final_dim) and probs.shape == (B, final_dim)
    assert jnp.allclose(logits, ref_logits, atol=2e-2, rtol=2e-2)
    assert jnp.allclose(probs, ref_probs, atol=2e-2, rtol=2e-2)
    assert jnp.allclose(probs.sum(axis=-1), 1.0, atol=1e-2)
    assert temp == temperature

    print("KERNEL_OK")
</pallas_src>

<mosaic_0001>
module attributes {stable_mosaic.version = 11 : i64} {
  func.func @_cond_categorical_kernel(%arg0: i32, %arg1: memref<16x32xbf16, #tpu.memory_space<vmem>>, %arg2: memref<32x32xbf16, #tpu.memory_space<vmem>>, %arg3: memref<1x32xf32, #tpu.memory_space<vmem>>, %arg4: memref<32x128xbf16, #tpu.memory_space<vmem>>, %arg5: memref<1x128xf32, #tpu.memory_space<vmem>>, %arg6: memref<16x128xf32, #tpu.memory_space<vmem>>, %arg7: memref<16x128xf32, #tpu.memory_space<vmem>>) attributes {dimension_semantics = [#tpu.dimension_semantics<parallel>], iteration_bounds = array<i64: 2>, scalar_prefetch = 0 : i64, scratch_operands = 0 : i64, tpu.core_type = #tpu.core_type<tc>, window_params = [{transform_indices = @transform_0, window_bounds = array<i64: 16, 32>}, {pipeline_mode = #tpu.pipeline_mode<synchronous>, transform_indices = @transform_1, window_bounds = array<i64: 32, 32>}, {pipeline_mode = #tpu.pipeline_mode<synchronous>, transform_indices = @transform_2, window_bounds = array<i64: 1, 32>}, {pipeline_mode = #tpu.pipeline_mode<synchronous>, transform_indices = @transform_3, window_bounds = array<i64: 32, 128>}, {pipeline_mode = #tpu.pipeline_mode<synchronous>, transform_indices = @transform_4, window_bounds = array<i64: 1, 128>}, {transform_indices = @transform_5, window_bounds = array<i64: 16, 128>}, {transform_indices = @transform_6, window_bounds = array<i64: 16, 128>}]} {
    %c0 = arith.constant 0 : index
    %c0_0 = arith.constant 0 : index
    %0 = vector.load %arg1[%c0, %c0_0] : memref<16x32xbf16, #tpu.memory_space<vmem>>, vector<16x32xbf16>
    %c0_1 = arith.constant 0 : index
    %c0_2 = arith.constant 0 : index
    %1 = vector.load %arg2[%c0_1, %c0_2] : memref<32x32xbf16, #tpu.memory_space<vmem>>, vector<32x32xbf16>
    %cst = arith.constant dense<0.000000e+00> : vector<16x32xf32>
    %2 = tpu.matmul %0, %1, %cst {dimension_numbers = #tpu.dot_dimension_numbers<[1], [0], [0], [1], [0, 0, 1, 1], [], []>} : vector<16x32xbf16>, vector<32x32xbf16>, vector<16x32xf32> -> vector<16x32xf32>
    %c0_3 = arith.constant 0 : index
    %c0_4 = arith.constant 0 : index
    %3 = vector.load %arg3[%c0_3, %c0_4] : memref<1x32xf32, #tpu.memory_space<vmem>>, vector<1x32xf32>
    %4 = vector.broadcast %3 : vector<1x32xf32> to vector<16x32xf32>
    %5 = arith.addf %2, %4 : vector<16x32xf32>
    %cst_5 = arith.constant 0.000000e+00 : f32
    %6 = vector.broadcast %cst_5 : f32 to vector<16x32xf32>
    %7 = arith.maximumf %5, %6 : vector<16x32xf32>
    %8 = arith.truncf %7 : vector<16x32xf32> to vector<16x32xbf16>
    %c0_6 = arith.constant 0 : index
    %c0_7 = arith.constant 0 : index
    %9 = vector.load %arg4[%c0_6, %c0_7] : memref<32x128xbf16, #tpu.memory_space<vmem>>, vector<32x128xbf16>
    %cst_8 = arith.constant dense<0.000000e+00> : vector<16x128xf32>
    %10 = tpu.matmul %8, %9, %cst_8 {dimension_numbers = #tpu.dot_dimension_numbers<[1], [0], [0], [1], [0, 0, 1, 1], [], []>} : vector<16x32xbf16>, vector<32x128xbf16>, vector<16x128xf32> -> vector<16x128xf32>
    %c0_9 = arith.constant 0 : index
    %c0_10 = arith.constant 0 : index
    %11 = vector.load %arg5[%c0_9, %c0_10] : memref<1x128xf32, #tpu.memory_space<vmem>>, vector<1x128xf32>
    %12 = vector.broadcast %11 : vector<1x128xf32> to vector<16x128xf32>
    %13 = arith.addf %10, %12 : vector<16x128xf32>
    %c0_11 = arith.constant 0 : index
    %c0_12 = arith.constant 0 : index
    %14 = vector.load %arg6[%c0_11, %c0_12] : memref<16x128xf32, #tpu.memory_space<vmem>>, vector<16x128xf32>
    tpu.vector_store %arg6[%c0_11, %c0_12], %13 {strides = array<i32>} : memref<16x128xf32, #tpu.memory_space<vmem>>, vector<16x128xf32>,
    %cst_13 = arith.constant dense<0xFF800000> : vector<16xf32>
    %15 = vector.multi_reduction <maximumf>, %13, %cst_13 [1] : vector<16x128xf32> to vector<16xf32>
    %16 = vector.shape_cast %15 : vector<16xf32> to vector<16x1xf32>
    %17 = vector.broadcast %16 : vector<16x1xf32> to vector<16x128xf32>
    %18 = arith.subf %13, %17 : vector<16x128xf32>
    %19 = math.exp %18 : vector<16x128xf32>
    %cst_14 = arith.constant dense<0.000000e+00> : vector<16xf32>
    %20 = vector.multi_reduction <add>, %19, %cst_14 [1] : vector<16x128xf32> to vector<16xf32>
    %21 = vector.shape_cast %20 : vector<16xf32> to vector<16x1xf32>
    %22 = tpu.reciprocal %21 {approx = true} : vector<16x1xf32> -> vector<16x1xf32>
    %23 = vector.broadcast %22 : vector<16x1xf32> to vector<16x128xf32>
    %24 = arith.mulf %19, %23 : vector<16x128xf32>
    %c0_15 = arith.constant 0 : index
    %c0_16 = arith.constant 0 : index
    %25 = vector.load %arg7[%c0_15, %c0_16] : memref<16x128xf32, #tpu.memory_space<vmem>>, vector<16x128xf32>
    tpu.vector_store %arg7[%c0_15, %c0_16], %24 {strides = array<i32>} : memref<16x128xf32, #tpu.memory_space<vmem>>, vector<16x128xf32>,
    return
  }
  func.func @transform_0(%arg0: i32) -> (i32, i32) {
    %c0_i32 = arith.constant 0 : i32
    %c0_i32_0 = arith.constant 0 : i32
    return %arg0, %c0_i32 : i32, i32
  }
  func.func @transform_1(%arg0: i32) -> (i32, i32) {
    %c0_i32 = arith.constant 0 : i32
    %c0_i32_0 = arith.constant 0 : i32
    %c0_i32_1 = arith.constant 0 : i32
    return %c0_i32, %c0_i32_0 : i32, i32
  }
  func.func @transform_2(%arg0: i32) -> (i32, i32) {
    %c0_i32 = arith.constant 0 : i32
    %c0_i32_0 = arith.constant 0 : i32
    %c0_i32_1 = arith.constant 0 : i32
    return %c0_i32, %c0_i32_0 : i32, i32
  }
  func.func @transform_3(%arg0: i32) -> (i32, i32) {
    %c0_i32 = arith.constant 0 : i32
    %c0_i32_0 = arith.constant 0 : i32
    %c0_i32_1 = arith.constant 0 : i32
    return %c0_i32, %c0_i32_0 : i32, i32
  }
  func.func @transform_4(%arg0: i32) -> (i32, i32) {
    %c0_i32 = arith.constant 0 : i32
    %c0_i32_0 = arith.constant 0 : i32
    %c0_i32_1 = arith.constant 0 : i32
    return %c0_i32, %c0_i32_0 : i32, i32
  }
  func.func @transform_5(%arg0: i32) -> (i32, i32) {
    %c0_i32 = arith.constant 0 : i32
    %c0_i32_0 = arith.constant 0 : i32
    return %arg0, %c0_i32 : i32, i32
  }
  func.func @transform_6(%arg0: i32) -> (i32, i32) {
    %c0_i32 = arith.constant 0 : i32
    %c0_i32_0 = arith.constant 0 : i32
    return %arg0, %c0_i32 : i32, i32
  }
}

</mosaic_0001>

<bundles_post_ra>
// kernel: tpu_custom_call.1
= control target key start
LH: loop header
LB: loop body
LE: loop exit
PB: predicated region body
PF: predicated region fallthrough
CT: control target
= control target key end

     0   :  { %12 = vsyncpa [#allocation3], 0  ;;  %s1148_s0 = inlined_call_operand.hbm [shape: bf16[32,32], index: 0, kind: input, shape index: {}]   ;;  %s1149_s1 = inlined_call_operand.hbm [shape: bf16[32,32], index: 1, kind: input, shape index: {}]   ;;  %s1150_s2 = inlined_call_operand.vmem [shape: f32[1,32], index: 2, kind: input, shape index: {}]   ;;  %s1151_s3 = inlined_call_operand.hbm [shape: bf16[32,128], index: 3, kind: input, shape index: {}]   ;;  %s1152_s4 = inlined_call_operand.vmem [shape: f32[1,128], index: 4, kind: input, shape index: {}]   ;;  %s1153_s5 = inlined_call_operand.hbm [shape: f32[32,128], index: 5, kind: output, shape index: {0}]   ;;  %s1154_s6 = inlined_call_operand.hbm [shape: f32[32,128], index: 6, kind: output, shape index: {1}]  }
   0x1   :  { %14 = vsyncpa [#allocation3 + $0x1], 0 }
   0x2   :  { %15 = vsyncpa [#allocation6], 0 }
   0x3   :  { %16 = vsyncpa [#allocation4], 0 }
   0x4   :  { %18 = vsyncpa [#allocation4 + $0x1], 0 }
   0x5   :  { %19 = vsyncpa [#allocation10], 0 }
   0x6   :  { %21 = vsyncpa [#allocation10 + $0x1], 0  ;;  %s963_s21 = smov 0   ;;  %s965_s22 = smov 0  }
   0x7   :  { %s967_s23 = smov 0   ;;  %s969_s24 = smov 0  }
   0x8 LB: > { %s984_s25 = sadd.s32 4294967295, %s920_s24   ;;  %s590_s26 = sadd.s32 4294967294, %s920_s24   ;;  %s920_s24 = sphi %s969_s24, %s1170_s24   ;;  %s916_s23 = sphi %s967_s23, %s1169_s23   ;;  %s912_s22 = sphi %s965_s22, %s1168_s22   ;;  %s908_s21 = sphi %s963_s21, %s1167_s21  }
   0x9   : > { %p47_p0 = scmp.ne.s32.totalorder %s912_s22, %s908_s21  ;;  %p48_p1 = scmp.eq.s32.totalorder %s984_s25, 0 }
   0xa   : > { %p155_p2 = scmp.eq.s32.totalorder %s984_s25, 1  ;;  %p161_p3 = scmp.eq.s32.totalorder %s590_s26, 1 }
   0xb   : > { %p993_p4 = por %p48_p1, %p47_p0  ;;  %p591_p5 = scmp.ge.s32.totalorder %s920_s24, 1 }
   0xc   : > { %p998_p6 = por %p161_p3, %p47_p0  ;;  %p194_p7 = scmp.lt.s32.totalorder %s920_s24, 3 }
   0xd   : > { %s205_s7 = sshll.u32 %s1149_s1, 4  ;;  %s922_s9 = smov [#allocation5]   ;;  %s206_s7 = int_to_ptr.hbm [resolvable:$true] %s205_s7 }
   0xe   : > { %p1006_p8 = pnand %p591_p5, %p194_p7  ;;  %s207_s10 = sshll.u32 %s922_s9, 4  ;;  %s208_s10 = int_to_ptr.vmem [resolvable:$true] %s207_s10 }
   0xf   : > { %s222_s13 = sshll.u32 %s1151_s3, 4  ;;  %s1155_s14 = smov 64   ;;  %s223_s13 = int_to_ptr.hbm [resolvable:$true] %s222_s13 }
  0x10   : > { %p656_p9 = pneg %p1006_p8  ;;  %s1156_s15 = smov 4  }
  0x11   : > { %s925_s16 = smov [#allocation7]   ;;  %s1025_s18 = sadd.s32 1, %s920_s24  }
  0x12   : > { %p657_p10 = pnand %p656_p9, %p48_p1  ;;  %s224_s17 = sshll.u32 %s925_s16, 4  ;;  %s225_s17 = int_to_ptr.vmem [resolvable:$true] %s224_s17 }
  0x13   : > { %s34_s19 = sadd.s32 1, %s916_s23  ;;  %s31_s20 = ssub.s32 %s920_s24, %s1025_s18 }
  0x14   : > { %659 = dma.hbm_to_vmem [thread:$0]  (!%p657_p10), %s206_s7, 256, %s208_s10, [#allocation6], %s1155_s14, %s1155_s14, %s1156_s15  }
  0x15   : > { %662 = dma.hbm_to_vmem [thread:$0]  (!%p657_p10), %s223_s13, 256, %s225_s17, [#allocation6], %s1155_s14, %s1155_s14, %s1156_s15  }
  0x16   : > { %p41_p12 = scmp.ne.s32.totalorder %s916_s23, %s912_s22  ;;  %p32_p13 = scmp.eq.s32.totalorder %s31_s20, 0 }
  0x17   : > { %p42_p0 = scmp.eq.s32.totalorder %s920_s24, 0  ;;  %p676_p5 = scmp.lt.s32.totalorder %s920_s24, 2 }
  0x18   : > { %p1035_p3 = por %p155_p2, %p41_p12  ;;  %s241_s30 = sand.u32 1, %s916_s23  }
  0x19   : > { %s1041_s29 = scalar_select %p32_p13, %s916_s23, %s34_s19  }
  0x1a   : > { %p43_p7 = por %p42_p0, %p41_p12  ;;  %s595_s7 = sshll.u32 %s241_s30, 3 }
  0x1b   : > { %s634_s9 = sshll.u32 %s920_s24, 3  ;;  %s245_s13 = scalar_lea.vmem [#allocation2], %s595_s7 }
  0x1c   : > { %s250_s12 = scalar_lea.hbm %s1148_s0, %s634_s9  ;;  %s253_s16 = sshll.u32 %s245_s13, 4  ;;  %s254_s16 = int_to_ptr.vmem [resolvable:$true] %s253_s16 }
  0x1d   : > { %s251_s17 = sshll.u32 %s250_s12, 4  ;;  %p1048_p2 = pnand %p676_p5, %p43_p7  ;;  %s252_s17 = int_to_ptr.hbm [resolvable:$true] %s251_s17 }
  0x1e   : > { %s242_s19 = scalar_lea.sflag [#allocation3], %s241_s30  ;;  %s788_s14 = sshra.s32 %s252_s17, 4  ;;  %s789_s14 = int_to_ptr.hbm [resolvable:$true] %s788_s14 }
  0x1f   : > { %s790_s15 = scalar_lea.hbm %s789_s14, 8  ;;  %p792_p10 = pneg %p1048_p2 }
  0x20   : > { %p791_p9 = scmp.ne.s32.totalorder %s789_s14, %s790_s15  ;;  %s795_s10 = scalar_lea.hbm %s1148_s0, 16 }
  0x21   : > { %p796_p0 = scmp.lt.s32.totalorder %s789_s14, %s1148_s0  ;;  %p797_p5 = scmp.lt.s32.totalorder %s795_s10, %s790_s15 }
  0x22   : > { %p793_p12 = pnand %p792_p10, %p791_p9 }
  0x23   : > { %p798_p7 = por %p797_p5, %p796_p0 }
  0x24   : > { %p794_p13 = pneg %p793_p12 }
  0x26   : > { %p799_p11 = pnand %p798_p7, %p794_p13 }
  0x28   : > { %802 = shalt.err (!%p799_p11)
}
  0x29   : > { %s1163_s30 = smov 4   ;;  %s1164_s13 = smov 64  }
  0x2a   : > { %666 = dma.hbm_to_vmem [thread:$0]  (!%p1048_p2), %s252_s17, 128, %s254_s16, %s242_s19, %s1164_s13, %s1164_s13, %s1163_s30  }
  0x2b   : > { %265 = sbr.rel (%p1006_p8) target bundleno = 591 (0x24f), region = 40  ;;  %s1068_s9 = sand.u32 (!%p1006_p8), 1, %s912_s22  }
  0x2c   : > { %s599_s14 = sshll.u32 (!%p1006_p8), %s1068_s9, 3  ;;  %s268_s15 = scalar_lea.sflag (!%p1006_p8), [#allocation3], %s1068_s9 }
  0x2d   : > { %s271_s7 = scalar_lea.vmem (!%p1006_p8), [#allocation2], %s599_s14 }
  0x30   : > { %891 = dma.done.wait (%p993_p4), %s268_s15, 128  }
  0x31   : > { %893 = vsyncadd (%p993_p4), %s268_s15, 4294967168 }
  0x32   : > { %895 = dma.done.wait (%p48_p1), [#allocation6], 512  }
  0x33   : > { %897 = vsyncadd (%p48_p1), [#allocation6], 4294966784  ;;  %v637_v0 = vld [vmem:[#allocation5 + $0x8] sm:$0xff]  ;;  %v636_v1 = vld [vmem:[#allocation5] sm:$0xff]  ;;  %vm347_vm0 = vcmask 261120   ;;  %s1157_s16 = sshll.u32 %s1068_s9, 4 }
  0x34   : > { %357 = vmatpush.bf16.msra.mxu0 %v637_v0  ;;  %v635_v2 = vld [vmem:[%s271_s7] sm:$0xff]  ;;  %s308_s19 = scalar_lea.vmem [#allocation8], %s1157_s16  ;;  %s640_s11 = sshll.u32 %s984_s25, 4 }
  0x35   : > { %v639_v3 = vld [vmem:[#allocation7 + $0x8] sm:$0xff]  ;;  %v638_v4 = vld [vmem:[#allocation7] sm:$0xff]  ;;  %s445_s10 = sshll.u32 %s308_s19, 4  ;;  %s444_s13 = scalar_lea.hbm %s1153_s5, %s640_s11  ;;  %s446_s10 = int_to_ptr.vmem [resolvable:$true] %s445_s10 }
  0x36   : > { %397 = vmatpush.bf16.msra.mxu1 %v639_v3  ;;  %v718_v6 = vld [vmem:[%s1150_s2] ss:$0 sm:$0xff]  ;;  %s447_s14 = sshll.u32 %s444_s13, 4  ;;  %s428_s15 = scalar_lea.sflag [#allocation4], %s1068_s9  ;;  %s448_s14 = int_to_ptr.hbm [resolvable:$true] %s447_s14 }
  0x37   : > { %v719_v13 = vld [vmem:[%s1152_s4] ss:$0 sm:$0xff]  ;;  %s832_s7 = sshra.s32 %s448_s14, 4  ;;  %s838_s20 = scalar_lea.hbm %s1153_s5, 32  ;;  %s833_s7 = int_to_ptr.hbm [resolvable:$true] %s832_s7 }
  0x38   : > { %358 = vmatpush.bf16.msra.mxu0 %v636_v1  ;;  %s834_s27 = scalar_lea.hbm %s833_s7, 16  ;;  %p839_p11 = scmp.lt.s32.totalorder %s833_s7, %s1153_s5 }
  0x39   : > { %p835_p1 = scmp.ne.s32.totalorder %s833_s7, %s834_s27  ;;  %p840_p2 = scmp.lt.s32.totalorder %s838_s20, %s834_s27 }
  0x3a   : > { %398 = vmatpush.bf16.msra.mxu1 %v638_v4 }
  0x3b   : > { %616 = vmatmul.msk.bf16.vlgmr.msra.gmra.mxu0 %vm347_vm0, %v635_v2  ;;  %p836_p4 = pnand %p835_p1, %p1035_p3  ;;  %p841_p9 = por %p840_p2, %p839_p11 }
  0x3d   : > { %p837_p8 = pneg %p836_p4 }
  0x3f   : > { %p842_p10 = pnand %p841_p9, %p837_p8 }
  0xb8   : > { %v360_v5 = vpop.f32.mrf.mxu0 }
  0xb9   : > { %v361_v7 = vadd.f32 %v718_v6, %v360_v5 }
  0xbb   : > { %v365_v10 = vmax.f32 %v361_v7, 0.0 }
  0xc0   : > { %v362_v8 = vpop.f32.mrf.mxu0 }
  0xc1   : > { %v363_v9 = vadd.f32 %v718_v6, %v362_v8 }
  0xc3   : > { %v366_v11 = vmax.f32 %v363_v9, 0.0 }
  0xc5   : > { %v367_v12 = vpack.c.bf16 %v366_v11, %v365_v10 }
  0xc7   : > { %625 = vmatmul.msk.bf16.vlgmr.msra.gmra.mxu1 %vm347_vm0, %v367_v12 }
 0x144   : > { %v400_v14 = vpop.f32.mrf.mxu1 }
 0x145   : > { %v401_v15 = vadd.f32 %v719_v13, %v400_v14 }
 0x147   : > { %405 = vst [vmem:[%s308_s19] sm:$0xff] %v401_v15  ;;  %407 = vmax.xlane.f32.xlu0 %v401_v15 }
 0x14c   : > { %v402_v16 = vpop.f32.mrf.mxu1 }
 0x14d   : > { %v403_v17 = vadd.f32 %v719_v13, %v402_v16 }
 0x14f   : > { %406 = vst [vmem:[%s308_s19 + $0x8] sm:$0xff] %v403_v17  ;;  %409 = vmax.xlane.f32.xlu0 %v403_v17 }
 0x1ba   : > { %v408_v18 = vpop.xlane.xlu0 %407 }
 0x1bb   : > { %v411_v19 = vsub.f32 %v401_v15, %v408_v18 }
 0x1bd   : > { %v413_v20 = vmul.f32 1.442695, %v411_v19 }
 0x1bf   : > { %720 = vpow2.f32 %v413_v20 }
 0x1c2   : > { %v410_v21 = vpop.xlane.xlu0 %409 }
 0x1c3   : > { %v412_v22 = vsub.f32 %v403_v17, %v410_v21 }
 0x1c5   : > { %v721_v23 = vpop.eup %720  ;;  %v415_v24 = vmul.f32 1.442695, %v412_v22 }
 0x1c6   : > { %417 = vadd.xlane.f32.xlu1 %v721_v23 }
 0x1c7   : > { %722 = vpow2.f32 %v415_v24 }
 0x1cd   : > { %v723_v25 = vpop.eup %722 }
 0x1ce   : > { %845 = shalt.err (!%p842_p10)
}
 0x1cf   : > { %s926_s12 = smov 128   ;;  %s927_s30 = smov 8   ;;  %419 = vadd.xlane.f32.xlu1 %v723_v25 }
 0x1d0   : > { %652 = dma.vmem_to_hbm [thread:$0]  (%p1035_p3), %s446_s10, 256, %s448_s14, %s428_s15, %s926_s12, %s926_s12, %s927_s30  }
 0x1d1   : > { %s1165_s16 = sshll.u32 %s1068_s9, 4  ;;  %s461_s8 = scalar_lea.hbm %s1154_s6, %s640_s11 }
 0x1d2   : > { %s315_s13 = scalar_lea.vmem [#allocation9], %s1165_s16  ;;  %s464_s20 = sshll.u32 %s461_s8, 4  ;;  %s465_s20 = int_to_ptr.hbm [resolvable:$true] %s464_s20 }
 0x1d3   : > { %s462_s17 = sshll.u32 %s315_s13, 4  ;;  %s433_s10 = scalar_lea.sflag [#allocation10], %s1068_s9  ;;  %s463_s17 = int_to_ptr.vmem [resolvable:$true] %s462_s17 }
 0x1d4   : > { %s860_s14 = sshra.s32 %s465_s20, 4  ;;  %s866_s16 = scalar_lea.hbm %s1154_s6, 32  ;;  %s861_s14 = int_to_ptr.hbm [resolvable:$true] %s860_s14 }
 0x1d5   : > { %s862_s15 = scalar_lea.hbm %s861_s14, 16  ;;  %p867_p5 = scmp.lt.s32.totalorder %s861_s14, %s1154_s6 }
 0x1d6   : > { %p863_p12 = scmp.ne.s32.totalorder %s861_s14, %s862_s15  ;;  %p868_p7 = scmp.lt.s32.totalorder %s866_s16, %s862_s15 }
 0x1d8   : > { %p864_p13 = pnand %p863_p12, %p1035_p3  ;;  %p869_p1 = por %p868_p7, %p867_p5 }
 0x1da   : > { %p865_p0 = pneg %p864_p13 }
 0x1dc   : > { %p870_p4 = pnand %p869_p1, %p865_p0 }
 0x239   : > { %v418_v26 = vpop.xlane.xlu1 %417 }
 0x23a   : > { %724 = vrcp.f32 %v418_v26 }
 0x240   : > { %v725_v27 = vpop.eup %724 }
 0x241   : > { %v423_v28 = vmul.f32 %v725_v27, %v721_v23 }
 0x242   : > { %v420_v29 = vpop.xlane.xlu1 %419 }
 0x243   : > { %726 = vrcp.f32 %v420_v29  ;;  %425 = vst [vmem:[%s315_s13] sm:$0xff] %v423_v28 }
 0x249   : > { %v727_v30 = vpop.eup %726 }
 0x24a   : > { %v424_v31 = vmul.f32 %v727_v30, %v723_v25 }
 0x24c   : > { %426 = vst [vmem:[%s315_s13 + $0x8] sm:$0xff] %v424_v31 }
 0x24d   : > { %873 = shalt.err (!%p870_p4)
}
 0x24e   : > { %653 = dma.vmem_to_hbm [thread:$0]  (%p1035_p3), %s463_s17, 256, %s465_s20, %s433_s10, %s926_s12, %s926_s12, %s927_s30  }
 0x24f PF: > { %s479_s9 = sand.u32 1, %s908_s21   ;;  %p1166_p8 = scmp.ge.s32.totalorder %s920_s24, 2 }
 0x250   : > { %s480_s13 = scalar_lea.sflag [#allocation4], %s479_s9 }
 0x251   : > { %p668_p11 = pnand %p1166_p8, %p998_p6 }
 0x253   : > { %p669_p2 = pneg %p668_p11 }
 0x255   : > { %899 = dma.done.wait (%p669_p2), %s480_s13, 256  }
 0x256   : > { %901 = vsyncadd (%p669_p2), %s480_s13, 4294967040  ;;  %s490_s27 = scalar_lea.sflag [#allocation10], %s479_s9 }
 0x257   : > { %903 = dma.done.wait (%p669_p2), %s490_s27, 256  }
 0x258   : > { %905 = vsyncadd (%p669_p2), %s490_s27, 4294967040  ;;  %p24_p3 = scmp.ge.s32.totalorder %s1025_s18, 4   ;;  %s1167_s21 = smov %s912_s22 }
 0x259   : > { %s1168_s22 = smov %s916_s23  ;;  %s1169_s23 = smov %s1041_s29 }
 0x25a   : > { %s1170_s24 = smov %s1025_s18  ;;  %26 = sbr.rel (!%p24_p3) target bundleno = 8 (0x8), region = 110 }
 0x25f   :  { %496 = vsyncpa [#allocation3], 1 }
 0x260   :  { %498 = vsyncpa [#allocation3 + $0x1], 1 }
 0x261   :  { %499 = vsyncpa [#allocation6], 1 }
 0x262   :  { %500 = vsyncpa [#allocation4], 1 }
 0x263   :  { %502 = vsyncpa [#allocation4 + $0x1], 1 }
 0x264   :  { %503 = vsyncpa [#allocation10], 1 }
 0x265   :  { %505 = vsyncpa [#allocation10 + $0x1], 1 }

</bundles_post_ra>
